<compile_context>
chip_gen: v6e
topology: v6e:2x2x1
jax: 0.10.0
libtpu: 0.0.40
codegen_flags: <defaults>
</compile_context>

<pallas_src>
from functools import partial

import jax
import jax.numpy as jnp
from jax.experimental import pallas as pl
from jax.experimental.pallas import tpu as pltpu


# ----------------------------------------------------------------------------
# Tiling helpers
# ----------------------------------------------------------------------------
def _round_up(x, m):
    return (x + m - 1) // m * m


def _choose_m_tile(M, tm_cap, vmem_cap_rows):
    """Pick (tm, Mp): tm aligned to the bf16 native sublane tile, Mp = padded M."""
    cap = max(16, min(tm_cap, vmem_cap_rows))
    m_full = _round_up(M, 16)            # bf16 native tile is (16, 128)
    if m_full <= cap:
        return m_full, m_full            # whole M in one tile, minimal padding
    tm = max(128, (cap // 128) * 128)    # large, 128-multiple M tiles
    return tm, _round_up(M, tm)


# ----------------------------------------------------------------------------
# Pallas kernel: one MXU pass per M tile, resident weight + fused bias
# ----------------------------------------------------------------------------
def _matmul_bias_kernel(a_ref, w_ref, bias_ref, o_ref):
    acc = jnp.dot(a_ref[...], w_ref[...], preferred_element_type=jnp.float32)
    o_ref[...] = (acc + bias_ref[...]).astype(o_ref.dtype)


def pallas_matmul_bias(
    x,
    w,
    b,
    *,
    tm=512,
    out_dtype=jnp.bfloat16,
    vmem_budget_bytes=24 * 1024 * 1024,
):
    """out = x @ w + b.

    x: (M, K), w: (K, N), b: (N,).  The whole (bf16) weight and the bias stay
    resident in VMEM (constant index_maps); the grid is 1-D over M so the
    activation streams from HBM exactly once.  K/N are padded to lane-dense
    multiples of 128 and sliced back outside.
    """
    M, K = x.shape
    K2, N = w.shape
    assert K == K2 and b.shape == (N,)

    Kp = _round_up(K, 128)
    Np = _round_up(N, 128)

    out_bytes = jnp.dtype(out_dtype).itemsize
    # VMEM footprint: resident W (bf16) + bias (f32) + double-buffered A (bf16)
    # and output tiles.  Sized to fit v7x's 32 MiB scoped default with headroom.
    fixed_bytes = Kp * Np * 2 + Np * 4
    per_row_bytes = 2 * Kp * 2 + 2 * Np * out_bytes
    vmem_cap_rows = max(16, (vmem_budget_bytes - fixed_bytes) // per_row_bytes)

    tm_e, Mp = _choose_m_tile(M, tm, vmem_cap_rows)

    xb = x.astype(jnp.bfloat16)
    wb = w.astype(jnp.bfloat16)
    if (Mp, Kp) != (M, K):
        xb = jnp.pad(xb, ((0, Mp - M), (0, Kp - K)))
    if (Kp, Np) != (K, N):
        wb = jnp.pad(wb, ((0, Kp - K), (0, Np - N)))
    bias = b.astype(jnp.float32)
    if Np != N:
        bias = jnp.pad(bias, (0, Np - N))
    bias = bias.reshape(1, Np)

    grid = (Mp // tm_e,)

    out = pl.pallas_call(
        _matmul_bias_kernel,
        out_shape=jax.ShapeDtypeStruct((Mp, Np), out_dtype),
        grid_spec=pltpu.PrefetchScalarGridSpec(
            num_scalar_prefetch=0,
            grid=grid,
            in_specs=[
                pl.BlockSpec((tm_e, Kp), lambda i: (i, 0)),   # streamed activation
                pl.BlockSpec((Kp, Np), lambda i: (0, 0)),     # resident weight
                pl.BlockSpec((1, Np), lambda i: (0, 0)),      # resident bias
            ],
            out_specs=pl.BlockSpec((tm_e, Np), lambda i: (i, 0)),
        ),
        compiler_params=pltpu.CompilerParams(
            dimension_semantics=("parallel",),
            vmem_limit_bytes=32 * 1024 * 1024,   # > v5e's 16 MiB scoped default
        ),
    )(xb, wb, bias)

    if (Mp, Np) != (M, N):
        out = out[:M, :N]
    return out


# ----------------------------------------------------------------------------
# PatchEmbedding forward
# ----------------------------------------------------------------------------
@partial(jax.jit, static_argnames=("patch_size", "out_dtype"))
def patch_embedding_forward(x, conv_w, conv_b, *, patch_size, out_dtype=jnp.bfloat16):
    """Equivalent of PatchEmbedding.forward.

    x:       (B, C, H, W)  NCHW
    conv_w:  (D, C, p, p)  Conv2d weight (kernel == stride == p)
    conv_b:  (D,)          Conv2d bias
    returns  (B, N, D)     with N = (H // p) * (W // p)
    """
    B, C, H, W = x.shape
    D = conv_w.shape[0]
    p = patch_size
    gh, gw = H // p, W // p
    N = gh * gw

    # Cast to bf16 BEFORE the unfold so the transpose copy moves half the bytes
    # and the in-kernel cast is a no-op under jit.
    xb = x.astype(jnp.bfloat16)
    patches = (
        xb.reshape(B, C, gh, p, gw, p)
          .transpose(0, 2, 4, 1, 3, 5)            # (B, gh, gw, C, p, p)
          .reshape(B * N, C * p * p)
    )
    # TODO(synk): fold this unfold into the kernel's own DMA (grid over
    # (b, patch-row) with an NCHW BlockSpec + in-kernel XLU rearrange) so the
    # (B*N, K) patch matrix is never materialized in HBM.
    w_mat = conv_w.astype(jnp.bfloat16).reshape(D, C * p * p).T   # (K, D)

    out = pallas_matmul_bias(patches, w_mat, conv_b, out_dtype=out_dtype)
    return out.reshape(B, N, D)


# ----------------------------------------------------------------------------
# Main
# ----------------------------------------------------------------------------
if __name__ == "__main__":
    # Small config consistent with the module: 16x16 image, patch 8, 4 channels,
    # embedding_dim 32  ->  N = 4 patches.
    B, C, IMG, PATCH, D = 2, 4, 16, 8, 32
    N = (IMG // PATCH) ** 2
    K = C * PATCH * PATCH

    key = jax.random.PRNGKey(0)
    k_x, k_w, k_b = jax.random.split(key, 3)
    x = jax.random.normal(k_x, (B, C, IMG, IMG), dtype=jnp.float32)
    bound = 1.0 / (K ** 0.5)                      # Conv2d default init range
    conv_w = jax.random.uniform(k_w, (D, C, PATCH, PATCH), jnp.float32, -bound, bound)
    conv_b = jax.random.uniform(k_b, (D,), jnp.float32, -bound, bound)

    out = patch_embedding_forward(x, conv_w, conv_b, patch_size=PATCH)
    out = jax.block_until_ready(out)

    assert out.shape == (B, N, D), out.shape
    out_f32 = out.astype(jnp.float32)
    assert bool(jnp.all(jnp.isfinite(out_f32)))

    # Reference: same bf16 input rounding, f32 math (the kernel accumulates in
    # f32; the only remaining difference is the bf16 output cast).
    patches_ref = (
        x.reshape(B, C, IMG // PATCH, PATCH, IMG // PATCH, PATCH)
         .transpose(0, 2, 4, 1, 3, 5)
         .reshape(B * N, K)
    ).astype(jnp.bfloat16).astype(jnp.float32)
    w_ref = conv_w.reshape(D, K).astype(jnp.bfloat16).astype(jnp.float32)
    ref = (patches_ref @ w_ref.T + conv_b).reshape(B, N, D)
    max_err = float(jnp.max(jnp.abs(out_f32 - ref)))
    assert max_err < 2e-2, max_err

    print("KERNEL_OK")
</pallas_src>

<mosaic_0001>
module attributes {stable_mosaic.version = 11 : i64} {
  func.func @_matmul_bias_kernel(%arg0: i32, %arg1: memref<16x256xbf16, #tpu.memory_space<vmem>>, %arg2: memref<256x128xbf16, #tpu.memory_space<vmem>>, %arg3: memref<1x128xf32, #tpu.memory_space<vmem>>, %arg4: memref<16x128xbf16, #tpu.memory_space<vmem>>) attributes {dimension_semantics = [#tpu.dimension_semantics<parallel>], iteration_bounds = array<i64: 1>, scalar_prefetch = 0 : i64, scratch_operands = 0 : i64, tpu.core_type = #tpu.core_type<tc>, window_params = [{transform_indices = @transform_0, window_bounds = array<i64: 16, 256>}, {pipeline_mode = #tpu.pipeline_mode<synchronous>, transform_indices = @transform_1, window_bounds = array<i64: 256, 128>}, {pipeline_mode = #tpu.pipeline_mode<synchronous>, transform_indices = @transform_2, window_bounds = array<i64: 1, 128>}, {transform_indices = @transform_3, window_bounds = array<i64: 16, 128>}]} {
    %c0 = arith.constant 0 : index
    %c0_0 = arith.constant 0 : index
    %0 = vector.load %arg1[%c0, %c0_0] : memref<16x256xbf16, #tpu.memory_space<vmem>>, vector<16x256xbf16>
    %c0_1 = arith.constant 0 : index
    %c0_2 = arith.constant 0 : index
    %1 = vector.load %arg2[%c0_1, %c0_2] : memref<256x128xbf16, #tpu.memory_space<vmem>>, vector<256x128xbf16>
    %cst = arith.constant dense<0.000000e+00> : vector<16x128xf32>
    %2 = tpu.matmul %0, %1, %cst {dimension_numbers = #tpu.dot_dimension_numbers<[1], [0], [0], [1], [0, 0, 1, 1], [], []>} : vector<16x256xbf16>, vector<256x128xbf16>, vector<16x128xf32> -> vector<16x128xf32>
    %c0_3 = arith.constant 0 : index
    %c0_4 = arith.constant 0 : index
    %3 = vector.load %arg3[%c0_3, %c0_4] : memref<1x128xf32, #tpu.memory_space<vmem>>, vector<1x128xf32>
    %4 = vector.broadcast %3 : vector<1x128xf32> to vector<16x128xf32>
    %5 = arith.addf %2, %4 : vector<16x128xf32>
    %6 = arith.truncf %5 : vector<16x128xf32> to vector<16x128xbf16>
    %c0_5 = arith.constant 0 : index
    %c0_6 = arith.constant 0 : index
    %7 = vector.load %arg4[%c0_5, %c0_6] : memref<16x128xbf16, #tpu.memory_space<vmem>>, vector<16x128xbf16>
    tpu.vector_store %arg4[%c0_5, %c0_6], %6 {strides = array<i32>} : memref<16x128xbf16, #tpu.memory_space<vmem>>, vector<16x128xbf16>,
    return
  }
  func.func @transform_0(%arg0: i32) -> (i32, i32) {
    %c0_i32 = arith.constant 0 : i32
    %c0_i32_0 = arith.constant 0 : i32
    return %arg0, %c0_i32 : i32, i32
  }
  func.func @transform_1(%arg0: i32) -> (i32, i32) {
    %c0_i32 = arith.constant 0 : i32
    %c0_i32_0 = arith.constant 0 : i32
    %c0_i32_1 = arith.constant 0 : i32
    return %c0_i32, %c0_i32_0 : i32, i32
  }
  func.func @transform_2(%arg0: i32) -> (i32, i32) {
    %c0_i32 = arith.constant 0 : i32
    %c0_i32_0 = arith.constant 0 : i32
    %c0_i32_1 = arith.constant 0 : i32
    return %c0_i32, %c0_i32_0 : i32, i32
  }
  func.func @transform_3(%arg0: i32) -> (i32, i32) {
    %c0_i32 = arith.constant 0 : i32
    %c0_i32_0 = arith.constant 0 : i32
    return %arg0, %c0_i32 : i32, i32
  }
}

</mosaic_0001>

<bundles_post_ra>
// kernel: patch_embedding_forward.1
= control target key start
LH: loop header
LB: loop body
LE: loop exit
PB: predicated region body
PF: predicated region fallthrough
CT: control target
= control target key end

     0   :  { %s366_s1 = inlined_call_operand.vmem [shape: bf16[256,128], index: 1, kind: input, shape index: {}]   ;;  %s367_s0 = inlined_call_operand.vmem [shape: bf16[16,256], index: 0, kind: input, shape index: {}]   ;;  %s368_s2 = inlined_call_operand.vmem [shape: f32[1,128], index: 2, kind: input, shape index: {}]   ;;  %s369_s3 = inlined_call_operand.vmem [shape: bf16[16,128], index: 3, kind: output, shape index: {}]  }
   0x1   :  { %v267_v0 = vld [vmem:[%s366_s1 + $0x78] sm:$0xff]   ;;  %v269_v2 = vld [vmem:[%s366_s1 + $0x70] sm:$0xff]   ;;  %v271_v4 = vld [vmem:[%s366_s1 + $0x68] sm:$0xff]  }
   0x2   :  { %v268_v1 = vld [vmem:[%s366_s1 + $0x38] sm:$0xff]   ;;  %245 = vmatprep.subr.bf16.mxu0 %v267_v0  ;;  %v270_v3 = vld [vmem:[%s366_s1 + $0x30] sm:$0xff]   ;;  %v272_v5 = vld [vmem:[%s366_s1 + $0x28] sm:$0xff]  }
   0x3   :  { %246 = vmatpush3.bf16.msra.mxu0 %v268_v1  ;;  %v273_v6 = vld [vmem:[%s366_s1 + $0x60] sm:$0xff]   ;;  %v275_v8 = vld [vmem:[%s366_s1 + $0x58] sm:$0xff]   ;;  %v277_v10 = vld [vmem:[%s366_s1 + $0x50] sm:$0xff]  }
   0x4   :  { %247 = vmatprep.subr.bf16.mxu0 %v269_v2  ;;  %v274_v7 = vld [vmem:[%s366_s1 + $0x20] sm:$0xff]   ;;  %v276_v9 = vld [vmem:[%s366_s1 + $0x18] sm:$0xff]   ;;  %v278_v12 = vld [vmem:[%s366_s1 + $0x10] sm:$0xff]  }
   0x5   :  { %v285_v11 = vld [vmem:[%s367_s0 + $0x4] ss:$8 sps:$4 sm:$0xff]   ;;  %v283_v17 = vld [vmem:[%s367_s0] ss:$8 sps:$4 sm:$0xff]  }
   0x6   :  { %194 = vmatprep.mubr.bf16.mxu0 %v285_v11  ;;  %v279_v13 = vld [vmem:[%s366_s1 + $0x48] sm:$0xff]   ;;  %v281_v15 = vld [vmem:[%s366_s1 + $0x40] sm:$0xff]  }
   0x7   :  { %248 = vmatpush3.bf16.msra.mxu0 %v270_v3  ;;  %v280_v14 = vld [vmem:[%s366_s1 + $0x8] sm:$0xff]   ;;  %v282_v16 = vld [vmem:[%s366_s1] sm:$0xff]  }
   0x8   :  { %249 = vmatprep.subr.bf16.mxu0 %v271_v4  ;;  %v217_v22 = vld [vmem:[%s368_s2] ss:$0 sm:$0xff] }
   0xb   :  { %250 = vmatpush3.bf16.msra.mxu0 %v272_v5 }
   0xc   :  { %251 = vmatprep.subr.bf16.mxu0 %v273_v6 }
   0xf   :  { %252 = vmatpush3.bf16.msra.mxu0 %v274_v7 }
  0x10   :  { %253 = vmatprep.subr.bf16.mxu0 %v275_v8 }
  0x13   :  { %254 = vmatpush3.bf16.msra.mxu0 %v276_v9 }
  0x14   :  { %255 = vmatprep.subr.bf16.mxu0 %v277_v10 }
  0x17   :  { %256 = vmatpush3.bf16.msra.mxu0 %v278_v12 }
  0x18   :  { %257 = vmatprep.subr.bf16.mxu0 %v279_v13 }
  0x1b   :  { %258 = vmatpush3.bf16.msra.mxu0 %v280_v14 }
  0x1c   :  { %259 = vmatprep.subr.bf16.mxu0 %v281_v15 }
  0x1f   :  { %260 = vmatpush3.bf16.msra.mxu0 %v282_v16 }
  0x22   :  { %195 = vmatmul.mubr.bf16.vlgmr.msra.gmra.mxu0 %v283_v17 }
  0xe2   :  { %v261_v18 = vpop.f32.mrf.mxu0 }
  0xe4   :  { %v262_v19 = vpop.f32.mrf.mxu0 }
  0xe5   :  { %v263_v21 = vadd.f32 %v262_v19, %v261_v18 }
  0xe6   :  { %v264_v20 = vpop.f32.mrf.mxu0 }
  0xe7   :  { %v197_v25 = vadd.f32 %v263_v21, %v217_v22 }
  0xe8   :  { %v265_v23 = vpop.f32.mrf.mxu0 }
  0xe9   :  { %v266_v24 = vadd.f32 %v265_v23, %v264_v20 }
  0xeb   :  { %v200_v26 = vadd.f32 %v266_v24, %v217_v22 }
  0xed   :  { %v243_v27 = vpack.c.bf16 %v200_v26, %v197_v25 }
  0xef   :  { %244 = vst [vmem:[%s369_s3] sm:$0xff] %v243_v27  }

</bundles_post_ra>
